<compile_context>
chip_gen: v6e
topology: v6e:2x2x1
jax: 0.10.0
libtpu: 0.0.40
codegen_flags: <defaults>
</compile_context>

<pallas_src>
import jax
import jax.numpy as jnp
from jax.experimental import pallas as pl
from jax.experimental.pallas import tpu as pltpu

_LANE_WIDTH = 512          # lane-dense slab width (multiple of 128)
_TARGET_BLOCK_BYTES = 4 << 20   # ~4 MiB per block: good on v5e/v6e/v7x
_VMEM_LIMIT_CAP = 48 << 20      # stay under v7x's 64 MiB physical VMEM


def _linreg_kernel(w_ref, b_ref, x_ref, o_ref):
    # w_ref / b_ref are shape-(1,) SMEM scalars; x_ref / o_ref are VMEM tiles.
    w = w_ref[0].astype(x_ref.dtype)
    b = b_ref[0].astype(x_ref.dtype)
    o_ref[...] = (w * x_ref[...] + b).astype(o_ref.dtype)


def _sublane_min(dtype) -> int:
    # (8,128) native f32 tile; packed dtypes need 16 (bf16) / 32 (int8/fp8) rows.
    itemsize = jnp.dtype(dtype).itemsize
    return max(8, 32 // itemsize)


def linear_regression(x: jax.Array, weight: jax.Array, bias: jax.Array) -> jax.Array:
    """Elementwise y = weight * x + bias with scalar weight/bias (shape (1,)).

    Accepts any input shape; internally reshapes to a lane-dense [N, 512] slab.
    """
    orig_shape = x.shape
    dtype = x.dtype
    itemsize = jnp.dtype(dtype).itemsize
    total = x.size

    lane = _LANE_WIDTH
    sub_min = _sublane_min(dtype)

    # Pad the flat buffer to a whole number of (sub_min, lane) tiles.
    chunk = lane * sub_min
    padded_total = ((total + chunk - 1) // chunk) * chunk
    flat = jnp.ravel(x)
    if padded_total != total:
        flat = jnp.pad(flat, (0, padded_total - total))
    n_rows = padded_total // lane
    x2 = flat.reshape(n_rows, lane)

    # ~4 MiB blocks, rounded down to the dtype sublane minimum, capped at N.
    rows_per_block = (_TARGET_BLOCK_BYTES // (lane * itemsize)) // sub_min * sub_min
    tile_rows = int(max(sub_min, min(n_rows, rows_per_block)))

    grid = (pl.cdiv(n_rows, tile_rows),)

    block_bytes = tile_rows * lane * itemsize
    # in + out, double-buffered each => 4x block, plus headroom; capped for v7x.
    vmem_limit = int(min(max(4 * block_bytes + (4 << 20), 16 << 20), _VMEM_LIMIT_CAP))

    y2 = pl.pallas_call(
        _linreg_kernel,
        out_shape=jax.ShapeDtypeStruct((n_rows, lane), dtype),
        grid=grid,
        in_specs=[
            pl.BlockSpec(memory_space=pltpu.SMEM),            # weight (1,)
            pl.BlockSpec(memory_space=pltpu.SMEM),            # bias   (1,)
            pl.BlockSpec((tile_rows, lane), lambda i: (i, 0)),
        ],
        out_specs=pl.BlockSpec((tile_rows, lane), lambda i: (i, 0)),
        compiler_params=pltpu.CompilerParams(
            dimension_semantics=("parallel",),   # shards grid across v7x's 2 TCs
            vmem_limit_bytes=vmem_limit,
        ),
    )(weight, bias, x2)

    return y2.reshape(-1)[:total].reshape(orig_shape)


if __name__ == "__main__":
    key = jax.random.PRNGKey(0)
    kw, kb, kx, kx2 = jax.random.split(key, 4)

    # Parameters matching nn.Parameter(torch.randn(1)) shapes/dtype.
    weight = jax.random.normal(kw, (1,), dtype=jnp.float32)
    bias = jax.random.normal(kb, (1,), dtype=jnp.float32)

    # Small f32 input consistent with the module's elementwise forward.
    x = jax.random.normal(kx, (2, 4, 16, 16), dtype=jnp.float32)
    y = jax.block_until_ready(linear_regression(x, weight, bias))
    y_ref = weight[0] * x + bias[0]
    assert y.shape == x.shape and y.dtype == x.dtype
    assert jnp.allclose(y, y_ref, atol=1e-6, rtol=1e-6)

    # Also exercise the dtype-aware (bf16, 16-row sublane) path with a ragged size.
    x_bf16 = jax.random.normal(kx2, (4, 16, 48), dtype=jnp.bfloat16)
    y_bf16 = jax.block_until_ready(linear_regression(x_bf16, weight, bias))
    y_bf16_ref = (weight[0].astype(jnp.bfloat16) * x_bf16
                  + bias[0].astype(jnp.bfloat16))
    assert y_bf16.shape == x_bf16.shape and y_bf16.dtype == x_bf16.dtype
    assert jnp.allclose(y_bf16.astype(jnp.float32),
                        y_bf16_ref.astype(jnp.float32), atol=2e-2, rtol=2e-2)

    print("KERNEL_OK")
</pallas_src>

<mosaic_0001>
module attributes {stable_mosaic.version = 11 : i64} {
  func.func @_linreg_kernel(%arg0: i32, %arg1: memref<1xf32, #tpu.memory_space<smem>>, %arg2: memref<1xf32, #tpu.memory_space<smem>>, %arg3: memref<8x512xf32, #tpu.memory_space<vmem>>, %arg4: memref<8x512xf32, #tpu.memory_space<vmem>>) attributes {dimension_semantics = [#tpu.dimension_semantics<parallel>], iteration_bounds = array<i64: 1>, scalar_prefetch = 0 : i64, scratch_operands = 0 : i64, tpu.core_type = #tpu.core_type<tc>, window_params = [{transform_indices = @transform_0, window_bounds = array<i64: 1>}, {transform_indices = @transform_1, window_bounds = array<i64: 1>}, {transform_indices = @transform_2, window_bounds = array<i64: 8, 512>}, {transform_indices = @transform_3, window_bounds = array<i64: 8, 512>}]} {
    %c0 = arith.constant 0 : index
    %0 = memref.load %arg1[%c0] : memref<1xf32, #tpu.memory_space<smem>>
    %c0_0 = arith.constant 0 : index
    %1 = memref.load %arg2[%c0_0] : memref<1xf32, #tpu.memory_space<smem>>
    %c0_1 = arith.constant 0 : index
    %c0_2 = arith.constant 0 : index
    %2 = vector.load %arg3[%c0_1, %c0_2] : memref<8x512xf32, #tpu.memory_space<vmem>>, vector<8x512xf32>
    %3 = vector.broadcast %0 : f32 to vector<8x512xf32>
    %4 = arith.mulf %3, %2 : vector<8x512xf32>
    %5 = vector.broadcast %1 : f32 to vector<8x512xf32>
    %6 = arith.addf %4, %5 : vector<8x512xf32>
    %c0_3 = arith.constant 0 : index
    %c0_4 = arith.constant 0 : index
    %7 = vector.load %arg4[%c0_3, %c0_4] : memref<8x512xf32, #tpu.memory_space<vmem>>, vector<8x512xf32>
    tpu.vector_store %arg4[%c0_3, %c0_4], %6 {strides = array<i32>} : memref<8x512xf32, #tpu.memory_space<vmem>>, vector<8x512xf32>,
    return
  }
  func.func @transform_0(%arg0: i32) -> i32 {
    %c0_i32 = arith.constant 0 : i32
    %c0_i32_0 = arith.constant 0 : i32
    return %c0_i32 : i32
  }
  func.func @transform_1(%arg0: i32) -> i32 {
    %c0_i32 = arith.constant 0 : i32
    %c0_i32_0 = arith.constant 0 : i32
    return %c0_i32 : i32
  }
  func.func @transform_2(%arg0: i32) -> (i32, i32) {
    %c0_i32 = arith.constant 0 : i32
    %c0_i32_0 = arith.constant 0 : i32
    return %arg0, %c0_i32 : i32, i32
  }
  func.func @transform_3(%arg0: i32) -> (i32, i32) {
    %c0_i32 = arith.constant 0 : i32
    %c0_i32_0 = arith.constant 0 : i32
    return %arg0, %c0_i32 : i32, i32
  }
}

</mosaic_0001>

<bundles_post_ra>
// kernel: tpu_custom_call.1
= control target key start
LH: loop header
LB: loop body
LE: loop exit
PB: predicated region body
PF: predicated region fallthrough
CT: control target
= control target key end

     0   :  { %10 = vsyncpa [#allocation5], 0  ;;  %s144_s0 = inlined_call_operand.<no memory space> [shape: f32[1], index: 0, kind: input, shape index: {}]   ;;  %s145_s1 = inlined_call_operand.<no memory space> [shape: f32[1], index: 1, kind: input, shape index: {}]   ;;  %s146_s2 = inlined_call_operand.hbm [shape: f32[8,512], index: 2, kind: input, shape index: {}]   ;;  %s147_s3 = inlined_call_operand.hbm [shape: f32[8,512], index: 3, kind: output, shape index: {}]  }
   0x1   :  { %11 = vsyncpa [#allocation6], 0  ;;  %s110_s12 = smov [#allocation4]  }
   0x2   :  { %s22_s13 = sshll.u32 %s110_s12, 4  ;;  %s23_s13 = int_to_ptr.vmem [resolvable:$true] %s22_s13 }
   0x3   :  { %s74_s14 = scalar_lea.vmem %s23_s13, 512  ;;  %p79_p1 = scmp.lt.s32.totalorder %s23_s13, %s23_s13 }
   0x4   :  { %p75_p0 = scmp.ne.s32.totalorder %s23_s13, %s74_s14  ;;  %p80_p2 = scmp.lt.s32.totalorder %s74_s14, %s74_s14 }
   0x6   :  { %p81_p3 = por %p80_p2, %p79_p1 }
   0x8   :  { %p82_p4 = pnand %p81_p3, %p75_p0 }
   0xa   :  { %85 = shalt.err (!%p82_p4)
}
   0xb   :  { %25 = dma.hbm_to_vmem [thread:$0]  %s146_s2, 512, %s23_s13, [#allocation5]  }
   0xc   :  { %106 = dma.done.wait [#allocation5], 512  }
   0xd   :  { %107 = vsyncadd [#allocation5], 4294966784  ;;  %v35_v0 = vstv %s144_s0  ;;  %v31_v1 = vld [vmem:[#allocation4] sm:$0xff]  ;;  %v40_v2 = vstv %s145_s1  ;;  %v32_v3 = vld [vmem:[#allocation4 + $0x8] sm:$0xff]  ;;  %s111_s21 = smov [#allocation7]  }
   0xe   :  { %v33_v4 = vld [vmem:[#allocation4 + $0x10] sm:$0xff]  ;;  %v36_v5 = vmul.f32 %v35_v0, %v31_v1  ;;  %v37_v6 = vmul.f32 %v35_v0, %v32_v3  ;;  %v34_v8 = vld [vmem:[#allocation4 + $0x18] sm:$0xff]  ;;  %s55_s22 = sshll.u32 %s111_s21, 4  ;;  %s56_s22 = int_to_ptr.vmem [resolvable:$true] %s55_s22 }
   0xf   :  { %v38_v7 = vmul.f32 %v35_v0, %v33_v4  ;;  %v39_v9 = vmul.f32 %v35_v0, %v34_v8  ;;  %s86_s0 = scalar_lea.vmem %s56_s22, 512  ;;  %p91_p6 = scmp.lt.s32.totalorder %s56_s22, %s56_s22 }
  0x10   :  { %v41_v10 = vadd.f32 %v40_v2, %v36_v5  ;;  %v42_v11 = vadd.f32 %v40_v2, %v37_v6  ;;  %p87_p5 = scmp.ne.s32.totalorder %s56_s22, %s86_s0  ;;  %p92_p7 = scmp.lt.s32.totalorder %s86_s0, %s86_s0 }
  0x11   :  { %v43_v12 = vadd.f32 %v40_v2, %v38_v7  ;;  %v44_v13 = vadd.f32 %v40_v2, %v39_v9 }
  0x12   :  { %45 = vst [vmem:[#allocation7] sm:$0xff] %v41_v10  ;;  %46 = vst [vmem:[#allocation7 + $0x8] sm:$0xff] %v42_v11  ;;  %p93_p8 = por %p92_p7, %p91_p6 }
  0x13   :  { %47 = vst [vmem:[#allocation7 + $0x10] sm:$0xff] %v43_v12  ;;  %48 = vst [vmem:[#allocation7 + $0x18] sm:$0xff] %v44_v13 }
  0x14   :  { %p94_p9 = pnand %p93_p8, %p87_p5 }
  0x16   :  { %97 = shalt.err (!%p94_p9)
}
  0x17   :  { %58 = dma.vmem_to_hbm [thread:$0]  %s56_s22, 512, %s147_s3, [#allocation6]  }
  0x18   :  { %108 = dma.done.wait [#allocation6], 512  }
  0x19   :  { %109 = vsyncadd [#allocation6], 4294966784 }
  0x1a   :  { %62 = vsyncpa [#allocation5], 1 }
  0x1b   :  { %63 = vsyncpa [#allocation6], 1 }

</bundles_post_ra>
